<compile_context>
chip_gen: v5e
topology: v5e:2x2
jax: 0.10.0
libtpu: 0.0.40
codegen_flags: <defaults>
</compile_context>

<pallas_src>
import jax
import jax.numpy as jnp
from jax.experimental import pallas as pl
from jax.experimental.pallas import tpu as pltpu


# --------------------------------------------------------------------------- #
# helpers
# --------------------------------------------------------------------------- #
def _round_up(x: int, m: int) -> int:
    return (x + m - 1) // m * m


def _sublane_unit(dtype) -> int:
    # f32 -> 8 rows, bf16 -> 16, int8/fp8 -> 32 (sub-32-bit dtypes pack on sublanes).
    return max(8, 32 // max(1, jnp.dtype(dtype).itemsize))


def _divisors(n: int):
    out = set()
    i = 1
    while i * i <= n:
        if n % i == 0:
            out.add(i)
            out.add(n // i)
        i += 1
    return sorted(out)


def _pick_tile(dim: int, unit: int, max_tile: int) -> int:
    """`dim` is a multiple of `unit`.  Return a tile (multiple of `unit`,
    <= max_tile): prefer a reasonably large exact divisor of `dim` (zero
    padding waste); otherwise the largest halving tile with <= ~12.5% waste."""
    if dim <= max_tile:
        return dim
    d = max_tile - (max_tile % unit)
    while d >= unit and dim % d:
        d -= unit
    if d >= max(128, max_tile // 4):
        return d                      # big exact divisor -> zero waste
    best = max(d, unit)
    allowance = max(unit, dim // 8)   # allow ~12.5% padding waste
    t = max_tile
    while t >= unit:
        if _round_up(dim, t) - dim <= allowance:
            return t
        t //= 2
    return best


def _vmem_capacity_bytes() -> int:
    try:
        return int(pltpu.get_tpu_info().vmem_capacity_bytes)
    except Exception:
        return 64 * 1024 * 1024       # conservative default (v7x per-TC VMEM)


# --------------------------------------------------------------------------- #
# kernels
# --------------------------------------------------------------------------- #
def _bl_kernel_multi_k(x_ref, w_ref, b_ref, o_ref, acc_ref):
    # x:(e,tm,tk)  w:(e,tk,tn)  b:(e,1,tn)  o:(e,tm,tn)  acc:(e,tm,tn) f32
    k = pl.program_id(3)
    prod = jnp.einsum(
        "ebk,ekn->ebn", x_ref[...], w_ref[...],
        preferred_element_type=jnp.float32,
    )

    @pl.when(k == 0)
    def _():
        acc_ref[...] = prod           # first K step: assign (no zero-fill store)

    @pl.when(k > 0)
    def _():
        acc_ref[...] += prod

    @pl.when(k == pl.num_programs(3) - 1)
    def _():
        o_ref[...] = (acc_ref[...] + b_ref[...].astype(jnp.float32)).astype(o_ref.dtype)


def _bl_kernel_single_k(x_ref, w_ref, b_ref, o_ref):
    # Whole K fits in one tile: no accumulator scratch needed.
    prod = jnp.einsum(
        "ebk,ekn->ebn", x_ref[...], w_ref[...],
        preferred_element_type=jnp.float32,
    )
    o_ref[...] = (prod + b_ref[...].astype(jnp.float32)).astype(o_ref.dtype)


# --------------------------------------------------------------------------- #
# wrapper
# --------------------------------------------------------------------------- #
def batched_linear(x: jax.Array, weight: jax.Array, bias: jax.Array) -> jax.Array:
    """Pallas equivalent of BatchedLinear.forward.

    x: (E, B, in_dim); weight: (E, out_dim, in_dim); bias: (E, out_dim)
    returns (E, B, out_dim)
    """
    assert x.ndim == 3
    E, B, in_dim = x.shape
    out_dim = weight.shape[1]
    assert weight.shape == (E, out_dim, in_dim)
    assert bias.shape == (E, out_dim)

    # NOTE: for trivially small problems a plain XLA einsum has lower launch
    # overhead; the Pallas path is kept unconditional so the kernel is always
    # exercised.
    out_dtype = x.dtype
    itemsize = jnp.dtype(x.dtype).itemsize
    sub = _sublane_unit(x.dtype)

    # ---- per-generation limits (v5e/v6e: 128 MiB VMEM; v7x: 64 MiB per TC).
    vmem_cap = _vmem_capacity_bytes()
    if vmem_cap >= 100 * 1024 * 1024:
        max_mn, max_k = 512, 1024
        step_budget = 36 * 1024 * 1024
        vmem_limit = 96 * 1024 * 1024
    else:
        max_mn, max_k = 512, 512
        step_budget = 20 * 1024 * 1024
        vmem_limit = 48 * 1024 * 1024

    # ---- alignment: dtype-aware sublanes on the batch dim, 128 lanes on K/N.
    m_al = _round_up(B, sub)
    k_al = _round_up(in_dim, 128)
    n_al = _round_up(out_dim, 128)

    tm = _pick_tile(m_al, sub, max_mn)
    tn = _pick_tile(n_al, 128, max_mn)
    tk = _pick_tile(k_al, 128, max_k)

    m_pad = _round_up(m_al, tm)
    n_pad = _round_up(n_al, tn)
    k_pad = _round_up(k_al, tk)

    m_steps = m_pad // tm
    n_steps = n_pad // tn
    k_steps = k_pad // tk

    # ---- ensemble blocking: target >= ~1 MiB weight DMA per grid step within
    #      the per-generation VMEM step budget (double-buffered inputs/outputs
    #      + f32 accumulator when K is split).
    def _step_bytes(et: int) -> int:
        per_member = tm * tk + tk * tn + tn + tm * tn
        acc = 0 if k_steps == 1 else et * tm * tn * 4
        return 2 * et * per_member * itemsize + acc

    target_w_dma = 1 << 20
    e_tile = 1
    for d in _divisors(E):
        if _step_bytes(d) > step_budget:
            break
        e_tile = d
        if d * tk * tn * itemsize >= target_w_dma:
            break

    # Keep >= 2 steps on a parallel axis so v7x's two TensorCores both get work
    # when the whole problem would otherwise be a single grid step.
    if E > 1 and m_steps == 1 and n_steps == 1 and E // e_tile == 1:
        e_tile = max(d for d in _divisors(E) if d < E)

    e_steps = E // e_tile

    # ---- operand prep (pads are conditional; weight transpose fuses with pad).
    need_m = m_pad != B
    need_k = k_pad != in_dim
    need_n = n_pad != out_dim

    x_p = x
    if need_m or need_k:
        x_p = jnp.pad(x, ((0, 0), (0, m_pad - B), (0, k_pad - in_dim)))

    # One-time transpose to (E, K, N) => MXU-native [tm,tk] x [tk,tn] tiles.
    w_t = jnp.swapaxes(weight, 1, 2)
    if need_k or need_n:
        w_t = jnp.pad(w_t, ((0, 0), (0, k_pad - in_dim), (0, n_pad - out_dim)))

    b_p = bias[:, None, :]
    if need_n:
        b_p = jnp.pad(b_p, ((0, 0), (0, 0), (0, n_pad - out_dim)))

    grid = (e_steps, m_steps, n_steps, k_steps)

    in_specs = [
        pl.BlockSpec((e_tile, tm, tk), lambda e, i, j, k: (e, i, k)),   # x
        pl.BlockSpec((e_tile, tk, tn), lambda e, i, j, k: (e, k, j)),   # weight (E,K,N)
        pl.BlockSpec((e_tile, 1, tn), lambda e, i, j, k: (e, 0, j)),    # bias
    ]
    out_spec = pl.BlockSpec((e_tile, tm, tn), lambda e, i, j, k: (e, i, j))

    if k_steps == 1:
        kernel = _bl_kernel_single_k
        scratch = []
    else:
        kernel = _bl_kernel_multi_k
        scratch = [pltpu.VMEM((e_tile, tm, tn), jnp.float32)]

    cost = pl.CostEstimate(
        flops=2 * E * B * in_dim * out_dim,
        transcendentals=0,
        bytes_accessed=(x.size + weight.size + bias.size + E * B * out_dim) * itemsize,
    )

    out_p = pl.pallas_call(
        kernel,
        out_shape=jax.ShapeDtypeStruct((E, m_pad, n_pad), out_dtype),
        grid_spec=pltpu.PrefetchScalarGridSpec(
            num_scalar_prefetch=0,
            grid=grid,
            in_specs=in_specs,
            out_specs=out_spec,
            scratch_shapes=scratch,
        ),
        compiler_params=pltpu.CompilerParams(
            dimension_semantics=("parallel", "parallel", "parallel", "arbitrary"),
            vmem_limit_bytes=vmem_limit,
        ),
        cost_estimate=cost,
    )(x_p, w_t, b_p)

    if need_m or need_n:
        out_p = out_p[:, :B, :out_dim]
    return out_p


def init_params(key, ensemble_size, in_dim, out_dim, dtype=jnp.float32):
    """Deterministic he-normal-style init (kaiming_normal_ analogue)."""
    kw, kb = jax.random.split(key)
    std_w = jnp.sqrt(2.0 / in_dim).astype(dtype)
    weight = std_w * jax.random.normal(kw, (ensemble_size, out_dim, in_dim), dtype)
    std_b = jnp.sqrt(2.0 / out_dim).astype(dtype)
    bias = std_b * jax.random.normal(kb, (ensemble_size, out_dim), dtype)
    return weight, bias


if __name__ == "__main__":
    ensemble_size = 4
    batch = 8
    in_dim = 32
    out_dim = 16

    key = jax.random.PRNGKey(0)
    kx, kp = jax.random.split(key)
    x = jax.random.normal(kx, (ensemble_size, batch, in_dim), jnp.float32)
    weight, bias = init_params(kp, ensemble_size, in_dim, out_dim)

    out = jax.block_until_ready(batched_linear(x, weight, bias))

    # reference check (same semantics as torch.bmm(x, w.transpose(1, 2)) + bias)
    ref = jnp.einsum("ebi,eoi->ebo", x, weight) + bias[:, None, :]
    assert out.shape == (ensemble_size, batch, out_dim)
    assert jnp.allclose(out, ref, atol=1e-5, rtol=1e-5), float(jnp.max(jnp.abs(out - ref)))

    print("KERNEL_OK")
</pallas_src>

<mosaic_0001>
module attributes {stable_mosaic.version = 11 : i64} {
  func.func @_bl_kernel_single_k(%arg0: i32, %arg1: i32, %arg2: i32, %arg3: i32, %arg4: memref<2x8x128xf32, #tpu.memory_space<vmem>>, %arg5: memref<2x128x128xf32, #tpu.memory_space<vmem>>, %arg6: memref<2x1x128xf32, #tpu.memory_space<vmem>>, %arg7: memref<2x8x128xf32, #tpu.memory_space<vmem>>) attributes {dimension_semantics = [#tpu.dimension_semantics<parallel>, #tpu.dimension_semantics<parallel>, #tpu.dimension_semantics<parallel>, #tpu.dimension_semantics<arbitrary>], iteration_bounds = array<i64: 2, 1, 1, 1>, scalar_prefetch = 0 : i64, scratch_operands = 0 : i64, tpu.core_type = #tpu.core_type<tc>, window_params = [{transform_indices = @transform_0, window_bounds = array<i64: 2, 8, 128>}, {transform_indices = @transform_1, window_bounds = array<i64: 2, 128, 128>}, {transform_indices = @transform_2, window_bounds = array<i64: 2, 1, 128>}, {transform_indices = @transform_3, window_bounds = array<i64: 2, 8, 128>}]} {
    %c0 = arith.constant 0 : index
    %c0_0 = arith.constant 0 : index
    %c0_1 = arith.constant 0 : index
    %0 = vector.load %arg4[%c0, %c0_0, %c0_1] : memref<2x8x128xf32, #tpu.memory_space<vmem>>, vector<2x8x128xf32>
    %c0_2 = arith.constant 0 : index
    %c0_3 = arith.constant 0 : index
    %c0_4 = arith.constant 0 : index
    %1 = vector.load %arg5[%c0_2, %c0_3, %c0_4] : memref<2x128x128xf32, #tpu.memory_space<vmem>>, vector<2x128x128xf32>
    "tpu.trace_start"() <{level = 10 : i32, message = "ebk,ekn->ebn"}> : () -> ()
    %cst = arith.constant dense<0.000000e+00> : vector<2x8x128xf32>
    %2 = tpu.matmul %0, %1, %cst {dimension_numbers = #tpu.dot_dimension_numbers<[2], [1], [1], [2], [0, 0, 0, 1, 1, 2], [0], [0]>} : vector<2x8x128xf32>, vector<2x128x128xf32>, vector<2x8x128xf32> -> vector<2x8x128xf32>
    "tpu.trace_stop"() : () -> ()
    %c0_5 = arith.constant 0 : index
    %c0_6 = arith.constant 0 : index
    %c0_7 = arith.constant 0 : index
    %3 = vector.load %arg6[%c0_5, %c0_6, %c0_7] : memref<2x1x128xf32, #tpu.memory_space<vmem>>, vector<2x1x128xf32>
    %4 = vector.broadcast %3 : vector<2x1x128xf32> to vector<2x8x128xf32>
    %5 = arith.addf %2, %4 : vector<2x8x128xf32>
    %c0_8 = arith.constant 0 : index
    %c0_9 = arith.constant 0 : index
    %c0_10 = arith.constant 0 : index
    %6 = vector.load %arg7[%c0_8, %c0_9, %c0_10] : memref<2x8x128xf32, #tpu.memory_space<vmem>>, vector<2x8x128xf32>
    tpu.vector_store %arg7[%c0_8, %c0_9, %c0_10], %5 {strides = array<i32>} : memref<2x8x128xf32, #tpu.memory_space<vmem>>, vector<2x8x128xf32>,
    return
  }
  func.func @transform_0(%arg0: i32, %arg1: i32, %arg2: i32, %arg3: i32) -> (i32, i32, i32) {
    %c0_i32 = arith.constant 0 : i32
    return %arg0, %arg1, %arg3 : i32, i32, i32
  }
  func.func @transform_1(%arg0: i32, %arg1: i32, %arg2: i32, %arg3: i32) -> (i32, i32, i32) {
    %c0_i32 = arith.constant 0 : i32
    return %arg0, %arg3, %arg2 : i32, i32, i32
  }
  func.func @transform_2(%arg0: i32, %arg1: i32, %arg2: i32, %arg3: i32) -> (i32, i32, i32) {
    %c0_i32 = arith.constant 0 : i32
    %c0_i32_0 = arith.constant 0 : i32
    return %arg0, %c0_i32, %arg2 : i32, i32, i32
  }
  func.func @transform_3(%arg0: i32, %arg1: i32, %arg2: i32, %arg3: i32) -> (i32, i32, i32) {
    %c0_i32 = arith.constant 0 : i32
    return %arg0, %arg1, %arg2 : i32, i32, i32
  }
}

</mosaic_0001>

<bundles_post_ra>
// kernel: tpu_custom_call.1
= control target key start
LH: loop header
LB: loop body
LE: loop exit
PB: predicated region body
PF: predicated region fallthrough
CT: control target
= control target key end

     0   :  { %s1086_s0 = inlined_call_operand.hbm [shape: f32[4,8,128], index: 0, kind: input, shape index: {}]   ;;  %s1087_s1 = inlined_call_operand.hbm [shape: f32[4,128,128], index: 1, kind: input, shape index: {}]   ;;  %s1088_s2 = inlined_call_operand.hbm [shape: f32[4,1,128], index: 2, kind: input, shape index: {}]   ;;  %s1089_s3 = inlined_call_operand.hbm [shape: f32[4,8,128], index: 3, kind: output, shape index: {}]  }
   0x1   :  { %1096 = sst [smem:[#allocation18_spill]] %s1087_s1 }
   0x2   :  { %8 = vsyncpa [#allocation3], 0 }
   0x3   :  { %10 = vsyncpa [#allocation3 + $0x1], 0 }
   0x4   :  { %11 = vsyncpa [#allocation6], 0 }
   0x5   :  { %13 = vsyncpa [#allocation6 + $0x1], 0 }
   0x6   :  { %14 = vsyncpa [#allocation4], 0 }
   0x7   :  { %16 = vsyncpa [#allocation4 + $0x1], 0  ;;  %s874_s12 = smov 0   ;;  %s876_s13 = smov 0  }
   0x8   :  { %s878_s14 = smov 0   ;;  %s880_s15 = smov 0  }
   0x9   :  { %s882_s16 = smov 0   ;;  %s884_s17 = smov 0  }
   0xa LB: > { %1097 = sst [smem:[#allocation12_spill]] %s826_s12  ;;  %s905_s18 = sadd.s32 4294967295, %s846_s17   ;;  %s846_s17 = sphi %s884_s17, %s22_s17   ;;  %s842_s16 = sphi %s882_s16, %s1119_s16   ;;  %s838_s15 = sphi %s880_s15, %s1118_s15   ;;  %s834_s14 = sphi %s878_s14, %s1114_s14   ;;  %s830_s13 = sphi %s876_s13, %s1117_s13   ;;  %s826_s12 = sphi %s874_s12, %s1116_s12  }
   0xb   : > { %1098 = sst [smem:[#allocation13_spill]] %s834_s14  ;;  %s564_s19 = sadd.s32 4294967294, %s846_s17  }
   0xc   : > { %1099 = sst [smem:[#allocation14_spill]] %s846_s17  ;;  %s48_s20 = sadd.s32 1, %s842_s16 }
   0xd   : > { %s59_s21 = sadd.s32 1, %s834_s14  ;;  %p50_p0 = scmp.ge.s32.totalorder %s48_s20, 2 }
   0xe   : > { %p66_p1 = scmp.ne.s32.totalorder %s834_s14, %s830_s13  ;;  %p67_p2 = scmp.eq.s32.totalorder %s846_s17, 0 }
   0xf   : > { %p72_p3 = scmp.ne.s32.totalorder %s830_s13, %s826_s12  ;;  %s1121_s20 = smov (%p50_p0, %s48_s20), 0 }
  0x10   : > { %1100 = sst [smem:[#allocation15_spill]] %s1121_s20  ;;  %p917_p4 = por %p67_p2, %p66_p1 }
  0x11   : > { %p73_p5 = scmp.eq.s32.totalorder %s905_s18, 0  ;;  %s52_s23 = ssub.s32 %s842_s16, %s1121_s20 }
  0x12   : > { %p158_p6 = scmp.eq.s32.totalorder %s905_s18, 1  ;;  %p57_p7 = scmp.eq.s32.totalorder %s52_s23, 0 }
  0x13   : > { %p925_p8 = por %p73_p5, %p72_p3  ;;  %p164_p10 = scmp.eq.s32.totalorder %s564_s19, 1 }
  0x14   : > { %p929_p9 = por %p158_p6, %p66_p1  ;;  %p566_p12 = scmp.ge.s32.totalorder %s846_s17, 2 }
  0x15   : > { %s934_s26 = scalar_select %p57_p7, %s834_s14, %s59_s21  }
  0x16   : > { %p936_p11 = por %p164_p10, %p72_p3  ;;  %p612_p13 = scmp.lt.s32.totalorder %s846_s17, 2 }
  0x17   : > { %1104 = sst [smem:[#allocation16_spill]] %s934_s26  ;;  %s943_s28 = sand.u32 1, %s834_s14  }
  0x18   : > { %s1105_s27 = scalar_select %p936_p11, 1, 0 }
  0x19   : > { %p947_p0 = pnand %p612_p13, %p917_p4  ;;  %s208_s30 = sand.u32 1, %s846_s17  }
  0x1a   : > { %1106 = sst [smem:[#allocation17_spill]] %s1105_s27  ;;  %s570_s4 = sshll.u32 %s943_s28, 8 }
  0x1b   : > { %s588_s5 = sshll.u32 %s842_s16, 8  ;;  %s212_s6 = scalar_lea.vmem [#allocation5], %s570_s4 }
  0x1c   : > { %s224_s7 = sshll.u32 %s212_s6, 4  ;;  %s1108_s1 = sld [smem:[#allocation18_spill]]  ;;  %s225_s7 = int_to_ptr.vmem [resolvable:$true] %s224_s7 }
  0x1d   : > { %p576_p1 = scmp.ge.s32.totalorder %s846_s17, 1  ;;  %p254_p2 = scmp.lt.s32.totalorder %s846_s17, 3 }
  0x1e   : > { %s959_s19 = scalar_lea.sflag [#allocation6], %s208_s30  ;;  %s848_s21 = smov 128  }
  0x1f   : > { %s849_s22 = smov 8   ;;  %p964_p3 = pnand %p576_p1, %p254_p2 }
  0x20   : > { %s567_s4 = sshll.u32 %s943_s28, 4  ;;  %s185_s20 = scalar_lea.sflag [#allocation3], %s943_s28 }
  0x22   : > { %s221_s10 = scalar_lea.hbm %s1108_s1, %s588_s5  ;;  %s586_s5 = sshll.u32 %s842_s16, 4 }
  0x23   : > { %s222_s11 = sshll.u32 %s221_s10, 4  ;;  %s195_s9 = scalar_lea.hbm %s1086_s0, %s586_s5  ;;  %s223_s11 = int_to_ptr.hbm [resolvable:$true] %s222_s11 }
  0x24   : > { %604 = dma.hbm_to_vmem [thread:$0]  (!%p947_p0), %s223_s11, 4096, %s225_s7, %s959_s19, %s848_s21, %s848_s21, %s849_s22  }
  0x25   : > { %s196_s10 = sshll.u32 %s195_s9, 4  ;;  %s188_s1 = scalar_lea.vmem [#allocation2], %s567_s4  ;;  %s197_s10 = int_to_ptr.hbm [resolvable:$true] %s196_s10 }
  0x26   : > { %s198_s30 = sshll.u32 %s188_s1, 4  ;;  %s574_s7 = sshll.u32 %s943_s28, 1  ;;  %s199_s30 = int_to_ptr.vmem [resolvable:$true] %s198_s30 }
  0x27   : > { %601 = dma.hbm_to_vmem [thread:$0]  (!%p947_p0), %s197_s10, 256, %s199_s30, %s185_s20, %s848_s21, %s848_s21, %s849_s22  }
  0x28   : > { %s575_s11 = sshll.u32 %s842_s16, 1  ;;  %s238_s12 = scalar_lea.vmem [#allocation7], %s574_s7 }
  0x29   : > { %s243_s17 = scalar_lea.hbm %s1088_s2, %s575_s11  ;;  %s246_s6 = sshll.u32 %s238_s12, 4  ;;  %s247_s6 = int_to_ptr.vmem [resolvable:$true] %s246_s6 }
  0x2a   : > { %s244_s27 = sshll.u32 %s243_s17, 4  ;;  %s850_s4 = smov 16   ;;  %s245_s27 = int_to_ptr.hbm [resolvable:$true] %s244_s27 }
  0x2b   : > { %s851_s5 = smov 1   ;;  %258 = sbr.rel (%p964_p3) target bundleno = 217 (0xd9), region = 32 }
  0x2c   : > { %607 = dma.hbm_to_vmem [thread:$0]  (!%p947_p0), %s245_s27, 32, %s247_s6, %s959_s19, %s850_s4, %s850_s4, %s851_s5  }
  0x2d   : > { %s987_s1 = sand.u32 (!%p964_p3), 1, %s830_s13  }
  0x2e   : > { %s577_s14 = sshll.u32 (!%p964_p3), %s987_s1, 4  ;;  %s261_s17 = scalar_lea.sflag (!%p964_p3), [#allocation3], %s987_s1 }
  0x2f   : > { %s993_s12 = scalar_lea.vmem (!%p964_p3), [#allocation2], %s577_s14 }
  0x30   : > { %813 = dma.done.wait (%p925_p8), %s261_s17, 256  }
  0x31   : > { %815 = vsyncadd (%p925_p8), %s261_s17, 4294967040  ;;  %s270_s20 = sand.u32 1, %s905_s18   ;;  %s578_s26 = sshll.u32 %s987_s1, 8 }
  0x32   : > { %s271_s27 = scalar_lea.sflag [#allocation6], %s270_s20  ;;  %s1001_s28 = scalar_lea.vmem [#allocation5], %s578_s26 }
  0x33   : > { %817 = dma.done.wait (%p925_p8), %s271_s27, 4128  }
  0x34   : > { %819 = vsyncadd (%p925_p8), %s271_s27, 4294963168  ;;  %v340_v0 = vld [vmem:[%s1001_s28 + $0x78] sm:$0xff]  ;;  %v339_v2 = vld [vmem:[%s1001_s28 + $0x70] sm:$0xff]  ;;  %s579_s18 = sshll.u32 %s987_s1, 1  ;;  %s589_s29 = sshll.u32 %s838_s15, 4 }
  0x35   : > { %v356_v1 = vld [vmem:[%s1001_s28 + $0xf8] sm:$0xff]  ;;  %365 = vmatpush.msra.mxu0 %v340_v0  ;;  %v355_v3 = vld [vmem:[%s1001_s28 + $0xf0] sm:$0xff]  ;;  %v338_v4 = vld [vmem:[%s1001_s28 + $0x68] sm:$0xff]  ;;  %s1022_s24 = scalar_lea.vmem [#allocation7], %s579_s18  ;;  %s421_s22 = scalar_lea.hbm %s1089_s3, %s589_s29 }
  0x36   : > { %385 = vmatpush.msra.mxu1 %v356_v1  ;;  %v354_v5 = vld [vmem:[%s1001_s28 + $0xe8] sm:$0xff]  ;;  %v337_v6 = vld [vmem:[%s1001_s28 + $0x60] sm:$0xff]  ;;  %v336_v8 = vld [vmem:[%s1001_s28 + $0x58] sm:$0xff]  ;;  %s317_s23 = scalar_lea.vmem [#allocation8], %s577_s14  ;;  %s424_s9 = sshll.u32 %s421_s22, 4  ;;  %s425_s9 = int_to_ptr.hbm [resolvable:$true] %s424_s9 }
  0x37   : > { %366 = vmatpush.msra.mxu0 %v339_v2  ;;  %v353_v7 = vld [vmem:[%s1001_s28 + $0xe0] sm:$0xff]  ;;  %v352_v9 = vld [vmem:[%s1001_s28 + $0xd8] sm:$0xff]  ;;  %v335_v10 = vld [vmem:[%s1001_s28 + $0x50] sm:$0xff]  ;;  %s422_s8 = sshll.u32 %s317_s23, 4  ;;  %s408_s15 = scalar_lea.sflag [#allocation4], %s987_s1  ;;  %s423_s8 = int_to_ptr.vmem [resolvable:$true] %s422_s8 }
  0x38   : > { %386 = vmatpush.msra.mxu1 %v355_v3  ;;  %v351_v11 = vld [vmem:[%s1001_s28 + $0xd0] sm:$0xff]  ;;  %v334_v12 = vld [vmem:[%s1001_s28 + $0x48] sm:$0xff]  ;;  %v333_v14 = vld [vmem:[%s1001_s28 + $0x40] sm:$0xff]  ;;  %s774_s10 = sshra.s32 %s425_s9, 4  ;;  %s780_s6 = scalar_lea.hbm %s1089_s3, 32  ;;  %s775_s10 = int_to_ptr.hbm [resolvable:$true] %s774_s10 }
  0x39   : > { %367 = vmatpush.msra.mxu0 %v338_v4  ;;  %v350_v13 = vld [vmem:[%s1001_s28 + $0xc8] sm:$0xff]  ;;  %v349_v15 = vld [vmem:[%s1001_s28 + $0xc0] sm:$0xff]  ;;  %v332_v16 = vld [vmem:[%s1001_s28 + $0x38] sm:$0xff]  ;;  %s776_s30 = scalar_lea.hbm %s775_s10, 16  ;;  %p781_p7 = scmp.lt.s32.totalorder %s775_s10, %s1089_s3 }
  0x3a   : > { %387 = vmatpush.msra.mxu1 %v354_v5  ;;  %v348_v17 = vld [vmem:[%s1001_s28 + $0xb8] sm:$0xff]  ;;  %v331_v18 = vld [vmem:[%s1001_s28 + $0x30] sm:$0xff]  ;;  %v330_v20 = vld [vmem:[%s1001_s28 + $0x28] sm:$0xff]  ;;  %p777_p4 = scmp.ne.s32.totalorder %s775_s10, %s776_s30  ;;  %p782_p8 = scmp.lt.s32.totalorder %s780_s6, %s776_s30 }
  0x3b   : > { %368 = vmatpush.msra.mxu0 %v337_v6  ;;  %v347_v19 = vld [vmem:[%s1001_s28 + $0xb0] sm:$0xff]  ;;  %v346_v21 = vld [vmem:[%s1001_s28 + $0xa8] sm:$0xff]  ;;  %v329_v22 = vld [vmem:[%s1001_s28 + $0x20] sm:$0xff] }
  0x3c   : > { %388 = vmatpush.msra.mxu1 %v353_v7  ;;  %v345_v23 = vld [vmem:[%s1001_s28 + $0xa0] sm:$0xff]  ;;  %v328_v24 = vld [vmem:[%s1001_s28 + $0x18] sm:$0xff]  ;;  %v327_v26 = vld [vmem:[%s1001_s28 + $0x10] sm:$0xff]  ;;  %p778_p5 = pnand %p777_p4, %p929_p9  ;;  %p783_p10 = por %p782_p8, %p781_p7 }
  0x3d   : > { %369 = vmatpush.msra.mxu0 %v336_v8  ;;  %v344_v25 = vld [vmem:[%s1001_s28 + $0x98] sm:$0xff]  ;;  %v343_v27 = vld [vmem:[%s1001_s28 + $0x90] sm:$0xff]  ;;  %v326_v28 = vld [vmem:[%s1001_s28 + $0x8] sm:$0xff] }
  0x3e   : > { %389 = vmatpush.msra.mxu1 %v352_v9  ;;  %v342_v29 = vld [vmem:[%s1001_s28 + $0x88] sm:$0xff]  ;;  %v325_v30 = vld [vmem:[%s1001_s28] sm:$0xff]  ;;  %p779_p6 = pneg %p778_p5 }
  0x3f   : > { %370 = vmatpush.msra.mxu0 %v335_v10  ;;  %v341_v31 = vld [vmem:[%s1001_s28 + $0x80] sm:$0xff]  ;;  %v324_v33 = vld [vmem:[%s993_s12 + $0x8] sm:$0xff] }
  0x40   : > { %390 = vmatpush.msra.mxu1 %v351_v11  ;;  %v323_v32 = vld [vmem:[%s993_s12] sm:$0xff]  ;;  %p784_p13 = pnand %p783_p10, %p779_p6 }
  0x41   : > { %371 = vmatpush.msra.mxu0 %v334_v12  ;;  %v668_v34 = vld [vmem:[%s1022_s24] ss:$0 sm:$0xff]  ;;  %v669_v35 = vld [vmem:[%s1022_s24 + $0x1] ss:$0 sm:$0xff] }
  0x42   : > { %391 = vmatpush.msra.mxu1 %v350_v13 }
  0x43   : > { %372 = vmatpush.msra.mxu0 %v333_v14 }
  0x44   : > { %392 = vmatpush.msra.mxu1 %v349_v15 }
  0x45   : > { %373 = vmatpush.msra.mxu0 %v332_v16 }
  0x46   : > { %393 = vmatpush.msra.mxu1 %v348_v17 }
  0x47   : > { %374 = vmatpush.msra.mxu0 %v331_v18 }
  0x48   : > { %394 = vmatpush.msra.mxu1 %v347_v19 }
  0x49   : > { %375 = vmatpush.msra.mxu0 %v330_v20 }
  0x4a   : > { %395 = vmatpush.msra.mxu1 %v346_v21 }
  0x4b   : > { %376 = vmatpush.msra.mxu0 %v329_v22 }
  0x4c   : > { %396 = vmatpush.msra.mxu1 %v345_v23 }
  0x4d   : > { %377 = vmatpush.msra.mxu0 %v328_v24 }
  0x4e   : > { %397 = vmatpush.msra.mxu1 %v344_v25 }
  0x4f   : > { %378 = vmatpush.msra.mxu0 %v327_v26 }
  0x50   : > { %398 = vmatpush.msra.mxu1 %v343_v27 }
  0x51   : > { %379 = vmatpush.msra.mxu0 %v326_v28 }
  0x52   : > { %399 = vmatpush.msra.mxu1 %v342_v29 }
  0x53   : > { %380 = vmatpush.msra.mxu0 %v325_v30 }
  0x54   : > { %400 = vmatpush.msra.mxu1 %v341_v31  ;;  %381 = vmatmul.f32.vlgmr.msra.gmra.mxu0 %v323_v32 }
  0x55   : > { %401 = vmatmul.f32.vlgmr.msra.gmra.mxu1 %v324_v33 }
  0xd1   : > { %v382_v36 = vpop.f32.mrf.mxu0 }
  0xd2   : > { %v402_v37 = vpop.f32.mrf.mxu1  ;;  %v383_v38 = vadd.f32 %v668_v34, %v382_v36 }
  0xd3   : > { %v403_v39 = vadd.f32 %v669_v35, %v402_v37 }
  0xd4   : > { %405 = vst [vmem:[%s317_s23] sm:$0xff] %v383_v38 }
  0xd5   : > { %406 = vst [vmem:[%s317_s23 + $0x8] sm:$0xff] %v403_v39 }
  0xd6   : > { %787 = shalt.err (!%p784_p13)
}
  0xd7   : > { %s852_s1 = smov 128   ;;  %s853_s14 = smov 8  }
  0xd8   : > { %596 = dma.vmem_to_hbm [thread:$0]  (%p929_p9), %s423_s8, 256, %s425_s9, %s408_s15, %s852_s1, %s852_s1, %s853_s14  }
  0xd9 PF: > { %s1110_s17 = sld [smem:[#allocation12_spill]]  ;;  %p609_p0 = pnand %p566_p12, %p936_p11 }
  0xda   : > { %s1112_s20 = sld [smem:[#allocation14_spill]] }
  0xdb   : > { %p610_p1 = pneg %p609_p0 }
  0xdf   : > { %s439_s26 = sand.u32 1, %s1110_s17  }
  0xe0   : > { %s440_s27 = scalar_lea.sflag [#allocation4], %s439_s26 }
  0xe1   : > { %821 = dma.done.wait (%p610_p1), %s440_s27, 256  }
  0xe2   : > { %823 = vsyncadd (%p610_p1), %s440_s27, 4294967040  ;;  %s22_s17 = sadd.s32 1, %s1112_s20   ;;  %s1113_s28 = sld [smem:[#allocation13_spill]] }
  0xe3   : > { %p19_p2 = scmp.ge.s32.totalorder %s22_s17, 4   ;;  %s1114_s14 = sld [smem:[#allocation16_spill]] }
  0xe4   : > { %s1115_s25 = sld [smem:[#allocation15_spill]]  ;;  %s1116_s12 = smov %s830_s13 }
  0xe5   : > { %s1118_s15 = smov %s842_s16 }
  0xe6   :  { %21 = sbr.rel (!%p19_p2) target bundleno = 10 (0xa), region = 101 }
  0xe8   : > { %s1117_s13 = smov %s1113_s28 }
  0xea   : > { %s1119_s16 = smov %s1115_s25 }
  0xeb   :  { %446 = vsyncpa [#allocation3], 1 }
  0xec   :  { %448 = vsyncpa [#allocation3 + $0x1], 1 }
  0xed   :  { %449 = vsyncpa [#allocation6], 1 }
  0xee   :  { %451 = vsyncpa [#allocation6 + $0x1], 1 }
  0xef   :  { %452 = vsyncpa [#allocation4], 1 }
  0xf0   :  { %454 = vsyncpa [#allocation4 + $0x1], 1 }

</bundles_post_ra>
